<compile_context>
chip_gen: v7x
topology: tpu7x:2x2x1
jax: 0.10.0
libtpu: 0.0.40
codegen_flags: <defaults>
</compile_context>

<pallas_src>
import functools

import jax
import jax.numpy as jnp
from jax.experimental import pallas as pl
from jax.experimental.pallas import tpu as pltpu

BN_EPS = 1e-5


# ----------------------------- kernels ------------------------------------- #

def _stats_kernel(x_ref, w_ref,            # inputs:  (Nb, Cin, Thw), (Cout, Cin)
                  sum_ref, sq_ref,         # outputs: (1, Cout, 1) per batch-block
                  *, nb):
    """Pass 1: per-channel partial sum / sum-of-squares of y = W @ x.

    The output blocks are indexed only by the batch-block grid axis, so they are
    VMEM-resident accumulators across the (inner, "arbitrary") HW-tile axis, and
    distinct per batch-block -> the batch-block axis can be "parallel" (megacore).
    """
    t_i = pl.program_id(1)

    @pl.when(t_i == 0)
    def _init():
        sum_ref[...] = jnp.zeros_like(sum_ref)
        sq_ref[...] = jnp.zeros_like(sq_ref)

    s_acc = jnp.zeros(sum_ref.shape[1:], jnp.float32)   # (Cout, 1)
    q_acc = jnp.zeros(sum_ref.shape[1:], jnp.float32)
    for i in range(nb):                                   # static, small unroll
        y = jnp.dot(w_ref[...], x_ref[i], preferred_element_type=jnp.float32)
        s_acc = s_acc + jnp.sum(y, axis=1, keepdims=True)
        q_acc = q_acc + jnp.sum(y * y, axis=1, keepdims=True)

    sum_ref[...] += s_acc[None]
    sq_ref[...] += q_acc[None]


def _normalize_kernel(x_ref, w_ref, scale_ref, shift_ref, o_ref, *, nb):
    """Pass 2: recompute y = W @ x for this tile, apply folded BN + ReLU."""
    scale = scale_ref[...]                                # (Cout, 1), f32
    shift = shift_ref[...]
    for i in range(nb):                                   # static, small unroll
        y = jnp.dot(w_ref[...], x_ref[i], preferred_element_type=jnp.float32)
        o_ref[i] = jnp.maximum(y * scale + shift, 0.0).astype(o_ref.dtype)


# ----------------------------- sizing helpers -------------------------------- #

def _vmem_limit_bytes():
    """Generation-aware scoped-VMEM budget."""
    cap = None
    try:
        cap = getattr(pltpu.get_tpu_info(), "vmem_capacity_bytes", None)
    except Exception:
        cap = None
    if not cap or cap <= 0:
        return 32 * 1024 * 1024                       # conservative fallback
    if cap >= 100 * 1024 * 1024:                      # v5e / v6e: 128 MiB physical
        return 96 * 1024 * 1024
    return min((cap * 3) // 4, 48 * 1024 * 1024)      # v7x: 64 MiB per TC -> 48 MiB


def _choose_tile_hw(hw_pad, max_tile_hw, budget_cols):
    """Largest multiple of 128 dividing hw_pad, <= max_tile_hw and VMEM budget."""
    cap = min(hw_pad, max_tile_hw, max(budget_cols, 128))
    cap = max(128, (cap // 128) * 128)
    if hw_pad <= cap:
        return hw_pad
    t = cap
    while t >= 128:
        if hw_pad % t == 0:
            return t
        t -= 128
    return 128   # unreachable: hw_pad is a multiple of 128


def _choose_batch_block(n, tile_hw, budget_cols, target_cols=2048):
    """Block several images per grid step when HW tiles are small (deep levels)."""
    best = 1
    for cand in range(1, n + 1):
        if n % cand != 0:
            continue
        cols = cand * tile_hw
        if cols <= max(target_cols, tile_hw) and cols <= max(budget_cols, tile_hw):
            best = cand
    return best


# ----------------------------- wrapper -------------------------------------- #

def conv_block(x_nchw, weight, bias=None, gamma=None, beta=None,
               *, max_tile_hw=2048, batch_block=None,
               compute_dtype=None, out_dtype=None):
    """ConvBlock forward: 1x1 Conv2d (+bias) -> BatchNorm2d(train) -> ReLU.

    x_nchw: (N, Cin, H, W); weight: (Cout, Cin) or (Cout, Cin, 1, 1).
    bias is accepted but unused: a pre-BN bias is exactly cancelled by the
    BatchNorm mean subtraction (saves a full add + keeps padded columns at 0).
    compute_dtype (e.g. jnp.bfloat16) optionally casts x / W once in the wrapper
    to halve HBM traffic; accumulation stays f32.
    """
    del bias
    n, cin, h, w = x_nchw.shape
    cout = weight.shape[0]
    hw = h * w
    m = n * hw
    out_dtype = out_dtype or x_nchw.dtype

    if gamma is None:
        gamma = jnp.ones((cout,), jnp.float32)
    if beta is None:
        beta = jnp.zeros((cout,), jnp.float32)

    # Free, layout-preserving reshape (no transposes through HBM).
    x3 = x_nchw.reshape(n, cin, hw)
    w_mat = weight.reshape(cout, cin)
    if compute_dtype is not None:
        x3 = x3.astype(compute_dtype)
        w_mat = w_mat.astype(compute_dtype)

    # Pad HW up to a multiple of 128: zero columns give y = 0 -> no effect on
    # stats (inv_m uses the true pixel count); pad is cropped after pass 2.
    hw_pad = ((hw + 127) // 128) * 128
    if hw_pad != hw:
        x3 = jnp.pad(x3, ((0, 0), (0, 0), (0, hw_pad - hw)))

    vmem_limit = _vmem_limit_bytes()
    x_item = jnp.dtype(x3.dtype).itemsize
    o_item = jnp.dtype(out_dtype).itemsize
    # Rough per-column VMEM cost: double-buffered x in, double-buffered out, f32 y.
    bytes_per_col = 2 * cin * x_item + 2 * cout * o_item + cout * 4
    budget_cols = max(128, (vmem_limit // 2) // bytes_per_col)

    tile_hw = _choose_tile_hw(hw_pad, max_tile_hw, budget_cols)
    assert hw_pad % tile_hw == 0
    n_t = hw_pad // tile_hw

    if batch_block is None:
        nb = _choose_batch_block(n, tile_hw, budget_cols)
    else:
        nb = batch_block
        assert n % nb == 0, "batch_block must divide N"
    n_b = n // nb

    x_spec = pl.BlockSpec((nb, cin, tile_hw), lambda b, t: (b, 0, t))
    w_spec = pl.BlockSpec((cout, cin), lambda b, t: (0, 0))
    part_spec = pl.BlockSpec((1, cout, 1), lambda b, t: (b, 0, 0))
    col_spec = pl.BlockSpec((cout, 1), lambda b, t: (0, 0))
    o_spec = pl.BlockSpec((nb, cout, tile_hw), lambda b, t: (b, 0, t))

    # ---- pass 1: per-batch-block partial per-channel sum / sumsq (megacore OK) ----
    psum, psq = pl.pallas_call(
        functools.partial(_stats_kernel, nb=nb),
        out_shape=(jax.ShapeDtypeStruct((n_b, cout, 1), jnp.float32),
                   jax.ShapeDtypeStruct((n_b, cout, 1), jnp.float32)),
        grid_spec=pltpu.PrefetchScalarGridSpec(
            num_scalar_prefetch=0,
            grid=(n_b, n_t),
            in_specs=[x_spec, w_spec],
            out_specs=(part_spec, part_spec),
        ),
        compiler_params=pltpu.CompilerParams(
            dimension_semantics=("parallel", "arbitrary"),
            vmem_limit_bytes=vmem_limit,
        ),
    )(x3, w_mat)

    # ---- tiny JAX epilogue: fold partials + gamma/beta into scale/shift ----
    inv_m = 1.0 / float(m)
    total_sum = jnp.sum(psum, axis=0)                        # (Cout, 1)
    total_sq = jnp.sum(psq, axis=0)
    mean = total_sum * inv_m
    var = jnp.maximum(total_sq * inv_m - mean * mean, 0.0)   # clamp: rsqrt NaN guard
    g_col = gamma.reshape(cout, 1).astype(jnp.float32)
    b_col = beta.reshape(cout, 1).astype(jnp.float32)
    scale = g_col * jax.lax.rsqrt(var + BN_EPS)
    shift = b_col - mean * scale

    # ---- pass 2: normalize + ReLU per lane-dense tile (fully parallel) ----
    out3 = pl.pallas_call(
        functools.partial(_normalize_kernel, nb=nb),
        out_shape=jax.ShapeDtypeStruct((n, cout, hw_pad), out_dtype),
        grid_spec=pltpu.PrefetchScalarGridSpec(
            num_scalar_prefetch=0,
            grid=(n_b, n_t),
            in_specs=[x_spec, w_spec, col_spec, col_spec],
            out_specs=o_spec,
        ),
        compiler_params=pltpu.CompilerParams(
            dimension_semantics=("parallel", "parallel"),
            vmem_limit_bytes=vmem_limit,
        ),
    )(x3, w_mat, scale, shift)

    if hw_pad != hw:
        out3 = out3[:, :, :hw]
    return out3.reshape(n, cout, h, w)


# ----------------------------- reference ------------------------------------ #

def reference(x_nchw, weight, bias, gamma, beta):
    """Pure-JAX reference of the PyTorch ConvBlock forward (including conv bias)."""
    n, cin, h, w = x_nchw.shape
    cout = weight.shape[0]
    x_mat = jnp.transpose(x_nchw, (0, 2, 3, 1)).reshape(-1, cin)
    y = x_mat @ weight.T + bias
    mean = jnp.mean(y, axis=0, keepdims=True)
    var = jnp.mean((y - mean) ** 2, axis=0, keepdims=True)
    out = jnp.maximum((y - mean) / jnp.sqrt(var + BN_EPS) * gamma + beta, 0.0)
    return jnp.transpose(out.reshape(n, h, w, cout), (0, 3, 1, 2))


if __name__ == "__main__":
    key = jax.random.PRNGKey(0)
    k_x, k_x2, k_w, k_b = jax.random.split(key, 4)

    N, C_IN, C_OUT, H, W = 2, 4, 8, 16, 16

    x = jax.random.normal(k_x, (N, C_IN, H, W), dtype=jnp.float32)

    # deterministic param init (PyTorch-style uniform bounds for conv)
    bound = 1.0 / (C_IN ** 0.5)
    weight = jax.random.uniform(k_w, (C_OUT, C_IN), jnp.float32, -bound, bound)
    bias = jax.random.uniform(k_b, (C_OUT,), jnp.float32, -bound, bound)
    gamma = jnp.ones((C_OUT,), jnp.float32)   # BatchNorm2d default weight
    beta = jnp.zeros((C_OUT,), jnp.float32)   # BatchNorm2d default bias

    ref = reference(x, weight, bias, gamma, beta)

    # Config A: small tiles + batch_block=1 exercises the multi-tile accumulation
    # AND multi-batch-block partial-sum path (grid = (2, 2)).
    out_a = jax.block_until_ready(
        conv_block(x, weight, bias, gamma, beta, max_tile_hw=128, batch_block=1))
    assert out_a.shape == (N, C_OUT, H, W)
    assert jnp.allclose(out_a, ref, atol=1e-4, rtol=1e-4), float(
        jnp.max(jnp.abs(out_a - ref)))

    # Config B: defaults (large tile, auto batch-blocking of several images/step).
    out_b = jax.block_until_ready(conv_block(x, weight, bias, gamma, beta))
    assert out_b.shape == (N, C_OUT, H, W)
    assert jnp.allclose(out_b, ref, atol=1e-4, rtol=1e-4), float(
        jnp.max(jnp.abs(out_b - ref)))

    # Config C: non-128-multiple spatial size exercises the HW-padding path.
    H2 = W2 = 10
    x2 = jax.random.normal(k_x2, (N, C_IN, H2, W2), dtype=jnp.float32)
    ref2 = reference(x2, weight, bias, gamma, beta)
    out_c = jax.block_until_ready(conv_block(x2, weight, bias, gamma, beta))
    assert out_c.shape == (N, C_OUT, H2, W2)
    assert jnp.allclose(out_c, ref2, atol=1e-4, rtol=1e-4), float(
        jnp.max(jnp.abs(out_c - ref2)))

    print("KERNEL_OK")
</pallas_src>

<mosaic_0001>
module attributes {stable_mosaic.version = 11 : i64} {
  func.func @_stats_kernel(%arg0: i32, %arg1: i32, %arg2: memref<1x4x128xf32, #tpu.memory_space<vmem>>, %arg3: memref<8x4xf32, #tpu.memory_space<vmem>>, %arg4: memref<1x8x1xf32, #tpu.memory_space<vmem>>, %arg5: memref<1x8x1xf32, #tpu.memory_space<vmem>>) attributes {dimension_semantics = [#tpu.dimension_semantics<parallel>, #tpu.dimension_semantics<arbitrary>], iteration_bounds = array<i64: 2, 2>, scalar_prefetch = 0 : i64, scratch_operands = 0 : i64, tpu.core_type = #tpu.core_type<tc>, window_params = [{transform_indices = @transform_0, window_bounds = array<i64: 1, 4, 128>}, {pipeline_mode = #tpu.pipeline_mode<synchronous>, transform_indices = @transform_1, window_bounds = array<i64: 8, 4>}, {transform_indices = @transform_2, window_bounds = array<i64: 1, 8, 1>}, {transform_indices = @transform_3, window_bounds = array<i64: 1, 8, 1>}]} {
    %c0_i32 = arith.constant 0 : i32
    %0 = arith.cmpi eq, %arg1, %c0_i32 : i32
    %1 = arith.extui %0 : i1 to i32
    %c0_i32_0 = arith.constant 0 : i32
    %2 = arith.cmpi ne, %1, %c0_i32_0 : i32
    scf.if %2 {
      %cst_21 = arith.constant 0.000000e+00 : f32
      %24 = vector.broadcast %cst_21 : f32 to vector<1x8x1xf32>
      %c0_22 = arith.constant 0 : index
      %c0_23 = arith.constant 0 : index
      %c0_24 = arith.constant 0 : index
      %25 = vector.load %arg4[%c0_22, %c0_23, %c0_24] : memref<1x8x1xf32, #tpu.memory_space<vmem>>, vector<1x8x1xf32>
      tpu.vector_store %arg4[%c0_22, %c0_23, %c0_24], %24 {strides = array<i32>} : memref<1x8x1xf32, #tpu.memory_space<vmem>>, vector<1x8x1xf32>,
      %cst_25 = arith.constant 0.000000e+00 : f32
      %26 = vector.broadcast %cst_25 : f32 to vector<1x8x1xf32>
      %c0_26 = arith.constant 0 : index
      %c0_27 = arith.constant 0 : index
      %c0_28 = arith.constant 0 : index
      %27 = vector.load %arg5[%c0_26, %c0_27, %c0_28] : memref<1x8x1xf32, #tpu.memory_space<vmem>>, vector<1x8x1xf32>
      tpu.vector_store %arg5[%c0_26, %c0_27, %c0_28], %26 {strides = array<i32>} : memref<1x8x1xf32, #tpu.memory_space<vmem>>, vector<1x8x1xf32>,
    } else {
    }
    %cst = arith.constant 0.000000e+00 : f32
    %3 = vector.broadcast %cst : f32 to vector<8x1xf32>
    %cst_1 = arith.constant 0.000000e+00 : f32
    %4 = vector.broadcast %cst_1 : f32 to vector<8x1xf32>
    %c0 = arith.constant 0 : index
    %c0_2 = arith.constant 0 : index
    %5 = vector.load %arg3[%c0, %c0_2] : memref<8x4xf32, #tpu.memory_space<vmem>>, vector<8x4xf32>
    %c0_3 = arith.constant 0 : index
    %c0_4 = arith.constant 0 : index
    %c0_5 = arith.constant 0 : index
    %6 = vector.load %arg2[%c0_3, %c0_4, %c0_5] : memref<1x4x128xf32, #tpu.memory_space<vmem>>, vector<1x4x128xf32>
    %7 = vector.shape_cast %6 : vector<1x4x128xf32> to vector<4x128xf32>
    %cst_6 = arith.constant dense<0.000000e+00> : vector<8x128xf32>
    %8 = tpu.matmul %5, %7, %cst_6 {dimension_numbers = #tpu.dot_dimension_numbers<[1], [0], [0], [1], [0, 0, 1, 1], [], []>} : vector<8x4xf32>, vector<4x128xf32>, vector<8x128xf32> -> vector<8x128xf32>
    %cst_7 = arith.constant dense<0.000000e+00> : vector<8xf32>
    %9 = vector.multi_reduction <add>, %8, %cst_7 [1] : vector<8x128xf32> to vector<8xf32>
    %10 = vector.shape_cast %9 : vector<8xf32> to vector<8x1xf32>
    %11 = arith.addf %3, %10 : vector<8x1xf32>
    %12 = arith.mulf %8, %8 : vector<8x128xf32>
    %cst_8 = arith.constant dense<0.000000e+00> : vector<8xf32>
    %13 = vector.multi_reduction <add>, %12, %cst_8 [1] : vector<8x128xf32> to vector<8xf32>
    %14 = vector.shape_cast %13 : vector<8xf32> to vector<8x1xf32>
    %15 = arith.addf %4, %14 : vector<8x1xf32>
    %c0_9 = arith.constant 0 : index
    %c0_10 = arith.constant 0 : index
    %c0_11 = arith.constant 0 : index
    %16 = vector.load %arg4[%c0_9, %c0_10, %c0_11] : memref<1x8x1xf32, #tpu.memory_space<vmem>>, vector<1x8x1xf32>
    %17 = vector.shape_cast %11 : vector<8x1xf32> to vector<1x8x1xf32>
    %18 = arith.addf %16, %17 : vector<1x8x1xf32>
    %c0_12 = arith.constant 0 : index
    %c0_13 = arith.constant 0 : index
    %c0_14 = arith.constant 0 : index
    %19 = vector.load %arg4[%c0_12, %c0_13, %c0_14] : memref<1x8x1xf32, #tpu.memory_space<vmem>>, vector<1x8x1xf32>
    tpu.vector_store %arg4[%c0_12, %c0_13, %c0_14], %18 {strides = array<i32>} : memref<1x8x1xf32, #tpu.memory_space<vmem>>, vector<1x8x1xf32>,
    %c0_15 = arith.constant 0 : index
    %c0_16 = arith.constant 0 : index
    %c0_17 = arith.constant 0 : index
    %20 = vector.load %arg5[%c0_15, %c0_16, %c0_17] : memref<1x8x1xf32, #tpu.memory_space<vmem>>, vector<1x8x1xf32>
    %21 = vector.shape_cast %15 : vector<8x1xf32> to vector<1x8x1xf32>
    %22 = arith.addf %20, %21 : vector<1x8x1xf32>
    %c0_18 = arith.constant 0 : index
    %c0_19 = arith.constant 0 : index
    %c0_20 = arith.constant 0 : index
    %23 = vector.load %arg5[%c0_18, %c0_19, %c0_20] : memref<1x8x1xf32, #tpu.memory_space<vmem>>, vector<1x8x1xf32>
    tpu.vector_store %arg5[%c0_18, %c0_19, %c0_20], %22 {strides = array<i32>} : memref<1x8x1xf32, #tpu.memory_space<vmem>>, vector<1x8x1xf32>,
    return
  }
  func.func @transform_0(%arg0: i32, %arg1: i32) -> (i32, i32, i32) {
    %c0_i32 = arith.constant 0 : i32
    %c0_i32_0 = arith.constant 0 : i32
    return %arg0, %c0_i32, %arg1 : i32, i32, i32
  }
  func.func @transform_1(%arg0: i32, %arg1: i32) -> (i32, i32) {
    %c0_i32 = arith.constant 0 : i32
    %c0_i32_0 = arith.constant 0 : i32
    %c0_i32_1 = arith.constant 0 : i32
    return %c0_i32, %c0_i32_0 : i32, i32
  }
  func.func @transform_2(%arg0: i32, %arg1: i32) -> (i32, i32, i32) {
    %c0_i32 = arith.constant 0 : i32
    %c0_i32_0 = arith.constant 0 : i32
    %c0_i32_1 = arith.constant 0 : i32
    return %arg0, %c0_i32, %c0_i32_0 : i32, i32, i32
  }
  func.func @transform_3(%arg0: i32, %arg1: i32) -> (i32, i32, i32) {
    %c0_i32 = arith.constant 0 : i32
    %c0_i32_0 = arith.constant 0 : i32
    %c0_i32_1 = arith.constant 0 : i32
    return %arg0, %c0_i32, %c0_i32_0 : i32, i32, i32
  }
}

</mosaic_0001>

<bundles_post_ra>
// kernel: tpu_custom_call.1
= control target key start
LH: loop header
LB: loop body
LE: loop exit
PB: predicated region body
PF: predicated region fallthrough
CT: control target
= control target key end

     0   :  { %9 = vsyncpa [#allocation3], 0  ;;  %s804_s0 = inlined_call_operand.hbm [shape: f32[2,4,256], index: 0, kind: input, shape index: {}]   ;;  %s805_s1 = inlined_call_operand.vmem [shape: f32[8,4], index: 1, kind: input, shape index: {}]   ;;  %s806_s2 = inlined_call_operand.vmem [shape: f32[2,8,1], index: 2, kind: output, shape index: {0}]   ;;  %s807_s3 = inlined_call_operand.vmem [shape: f32[2,8,1], index: 3, kind: output, shape index: {1}]  }
   0x1   :  { %11 = vsyncpa [#allocation3 + $0x1], 0  ;;  %s642_s12 = smov 0   ;;  %s644_s13 = smov 0  }
   0x2   :  { %s646_s14 = smov 0   ;;  %s648_s15 = smov 0  }
   0x3   :  { %s650_s16 = smov 0   ;;  %s652_s17 = smov 0  }
   0x4   :  { %s654_s18 = smov 0   ;;  %s656_s19 = smov 0  }
   0x5 LB: > { %s423_s20 = sadd.s32 4294967295, %s616_s19   ;;  %s26_s21 = sadd.s32 1, %s608_s17  ;;  %s616_s19 = sphi %s656_s19, %s17_s19   ;;  %s612_s18 = sphi %s654_s18, %s819_s18   ;;  %s608_s17 = sphi %s652_s17, %s818_s17   ;;  %s604_s16 = sphi %s650_s16, %s817_s16   ;;  %s600_s15 = sphi %s648_s15, %s816_s15   ;;  %s596_s14 = sphi %s646_s14, %s815_s14   ;;  %s592_s13 = sphi %s644_s13, %s814_s13   ;;  %s588_s12 = sphi %s642_s12, %s813_s12  }
   0x6   : > { %p27_p0 = scmp.ge.s32.totalorder %s26_s21, 2  ;;  %s29_s22 = sadd.s32 1, %s612_s18 }
   0x7   : > { %s38_s23 = sadd.s32 1, %s596_s14  ;;  %p45_p1 = scmp.ne.s32.totalorder %s596_s14, %s592_s13 }
   0x8   : > { %s821_s21 = smov (%p27_p0, %s26_s21), 0  ;;  %s823_s22 = smov (!%p27_p0, %s29_s22), %s612_s18 }
   0x9   : > { %s34_s24 = ssub.s32 %s608_s17, %s821_s21  ;;  %p46_p2 = scmp.eq.s32.totalorder %s616_s19, 0 }
   0xa   : > { %p31_p3 = scmp.ge.s32.totalorder %s823_s22, 2  ;;  %p51_p4 = scmp.ne.s32.totalorder %s592_s13, %s588_s12 }
   0xb   : > { %p693_p5 = por %p46_p2, %p45_p1  ;;  %p52_p6 = scmp.eq.s32.totalorder %s423_s20, 0 }
   0xc   : > { %s825_s22 = smov (%p31_p3, %s823_s22), 0  ;;  %p452_p8 = scmp.lt.s32.totalorder %s616_s19, 4 }
   0xd   : > { %p699_p7 = por %p52_p6, %p51_p4  ;;  %s33_s27 = ssub.s32 %s612_s18, %s825_s22 }
   0xe   : > { %s35_s28 = sor.u32 %s34_s24, %s33_s27  ;;  %s151_s29 = sand.u32 1, %s596_s14  }
   0xf   : > { %p36_p9 = scmp.eq.s32.totalorder %s35_s28, 0  ;;  %s427_s30 = sshll.u32 %s151_s29, 2 }
  0x10   : > { %s428_s4 = sshll.u32 %s612_s18, 1  ;;  %s155_s8 = scalar_lea.vmem [#allocation2], %s427_s30 }
  0x11   : > { %s709_s5 = scalar_select %p36_p9, %s596_s14, %s38_s23  }
  0x12   : > { %s160_s6 = sadd.s32 %s608_s17, %s428_s4  ;;  %s164_s9 = sshll.u32 %s155_s8, 4  ;;  %s717_s9 = int_to_ptr.vmem [resolvable:$true] %s164_s9 }
  0x13   : > { %s429_s7 = sshll.u32 %s160_s6, 6  ;;  %p723_p10 = pnand %p452_p8, %p693_p5 }
  0x14   : > { %s715_s12 = scalar_lea.hbm %s804_s0, %s429_s7  ;;  %s152_s23 = scalar_lea.sflag [#allocation3], %s151_s29 }
  0x15   : > { %s520_s24 = scalar_lea.hbm %s715_s12, 64  ;;  %p522_p0 = pneg %p723_p10 }
  0x16   : > { %p521_p13 = scmp.ne.s32.totalorder %s715_s12, %s520_s24  ;;  %s525_s28 = scalar_lea.hbm %s804_s0, 256 }
  0x17   : > { %p526_p3 = scmp.lt.u32.totalorder %s715_s12, %s804_s0  ;;  %p527_p4 = scmp.lt.u32.totalorder %s525_s28, %s520_s24 }
  0x18   : > { %p523_p1 = pnand %p522_p0, %p521_p13  ;;  %p529_p6 = scmp.lt.u32.totalorder %s520_s24, %s715_s12 }
  0x19   : > { %p528_p5 = por %p527_p4, %p526_p3 }
  0x1a   : > { %p524_p2 = pneg %p523_p1 }
  0x1b   : > { %p530_p8 = por %p529_p6, %p528_p5 }
  0x1d   : > { %p531_p9 = pnand %p530_p8, %p524_p2 }
  0x1f   : > { %534 = shalt.err (!%p531_p9)
}
  0x20   : > { %s535_s29 = scalar_lea.vmem %s717_s9, 64  ;;  %s618_s6 = smov [#allocation2]  }
  0x21   : > { %p536_p13 = scmp.ne.s32.totalorder %s717_s9, %s535_s29  ;;  %s540_s7 = sshll.u32 %s618_s6, 4  ;;  %s541_s7 = int_to_ptr.vmem [resolvable:$false] %s540_s7 }
  0x22   : > { %s542_s8 = scalar_lea.vmem %s541_s7, 128  ;;  %p543_p12 = scmp.lt.s32.totalorder %s717_s9, %s541_s7 }
  0x23   : > { %p538_p1 = pnand %p536_p13, %p522_p0  ;;  %p544_p3 = scmp.lt.s32.totalorder %s542_s8, %s535_s29 }
  0x25   : > { %p539_p11 = pneg %p538_p1  ;;  %p545_p4 = por %p544_p3, %p543_p12 }
  0x27   : > { %p546_p5 = pnand %p545_p4, %p539_p11 }
  0x29   : > { %549 = shalt.err (!%p546_p5)
}
  0x2a   : > { %451 = dma.hbm_to_vmem [thread:$0]  (!%p723_p10), %s715_s12, 64, %s717_s9, %s152_s23  }
  0x2b   : > { %p811_p2 = scmp.lt.s32.totalorder %s616_s19, 5  ;;  %p812_p6 = scmp.ge.s32.totalorder %s616_s19, 1 }
  0x2d   : > { %p170_p0 = pnand %p812_p6, %p811_p2 }
  0x2e   : > { %s175_s10 = sand.u32 (!%p170_p0), 1, %s592_s13  }
  0x2f   : > { %173 = sbr.rel (%p170_p0) target bundleno = 428 (0x1ac), region = 28  ;;  %s431_s11 = sshll.u32 (!%p170_p0), %s175_s10, 2 }
  0x30   : > { %s176_s24 = scalar_lea.sflag (!%p170_p0), [#allocation3], %s175_s10  ;;  %s179_s27 = scalar_lea.vmem (!%p170_p0), [#allocation2], %s431_s11 }
  0x36   : > { %583 = dma.done.wait (%p699_p7), %s176_s24, 64  }
  0x37   : > { %585 = vsyncadd (%p699_p7), %s176_s24, 4294967232  ;;  %p205_p11 = scmp.lt.s32.totalorder %s604_s16, 1  ;;  %p434_p10 = scmp.ne.s32.totalorder %s600_s15, 0 }
  0x38   : > { %vm217_vm0 = vcmask (!%p434_p10), 7168   ;;  %v619_v0 = vmov (!%p434_p10), 0.0  }
  0x39   : > { %s827_s16 = smov (!%p205_p11, %s604_s16), 1  ;;  %216 = sbr.rel (%p434_p10) target bundleno = 64 (0x40), region = 36 }
  0x3a   : > { %s432_s9 = sshll.u32 %s827_s16, 3 }
  0x3b   : > { %s208_s23 = scalar_lea.vmem %s806_s2, %s432_s9  ;;  %s771_s30 = scalar_lea.vmem %s807_s3, %s432_s9 }
  0x3c   : > { %218 = vst.msk [vmem:[%s208_s23] sm:$0xff] (!%p434_p10), %vm217_vm0, %v619_v0  ;;  %219 = vst.msk [vmem:[%s771_s30] sm:$0xff] (!%p434_p10), %vm217_vm0, %v619_v0 }
  0x40 PF: > { %v221_v1 = vld [vmem:[%s179_s27] sm:$0xf]  ;;  %vm226_vm1 = vcmask 1043456   ;;  %v620_v3 = vmov 0.0   ;;  %vm621_vm2 = vmmov 0   ;;  %vm222_vm3 = vcmask 31744  }
  0x41   : > { %v220_v2 = vld [vmem:[%s805_s1] sm:$0xff]  ;;  %441 = vmatprep.subr.mxu0 %v620_v3  ;;  %443 = vmatprep.mubr.msk.f32.mxu0 %vm621_vm2, %v620_v3  ;;  %vm309_vm4 = vcmask 7168  }
  0x42   : > { %442 = vmatpush3.msk.msra.mxu0 %vm226_vm1, %v221_v1 }
  0x43   : > { %444 = vmatmul.mubr.msk.f32.vlgmr.msra.gmra.mrb[0].mxu0 %vm222_vm3, %v220_v2  ;;  %v307_v7 = vld [vmem:[%s208_s23] sm:$0xff] }
  0x44   : > { %v311_v10 = vld [vmem:[%s771_s30] sm:$0xff] }
 0x116   : > { %v296_v4 = vpop.f32.mrb[0].mxu0 }
 0x117   : > { %300 = vadd.xlane.f32.xlu0 %v296_v4  ;;  %v445_v5 = vpop.f32.mrb[1].mxu0  ;;  %v303_v6 = vmul.f32 %v296_v4, %v296_v4 }
 0x11b   : > { %304 = vadd.xlane.f32.xlu0 %v303_v6 }
 0x1a4   : > { %v301_v8 = vpop.xlane.xlu0 %300 }
 0x1a5   : > { %v308_v9 = vadd.f32 %v307_v7, %v301_v8 }
 0x1a7   : > { %310 = vst.msk [vmem:[%s208_s23] sm:$0xff] %vm309_vm4, %v308_v9 }
 0x1a8   : > { %v305_v11 = vpop.xlane.xlu0 %304 }
 0x1a9   : > { %v312_v12 = vadd.f32 %v311_v10, %v305_v11 }
 0x1ab   : > { %313 = vst.msk [vmem:[%s771_s30] sm:$0xff] %vm309_vm4, %v312_v12 }
 0x1ac PF: > { %s17_s19 = sadd.s32 1, %s616_s19   ;;  %s813_s12 = smov %s592_s13 }
 0x1ad   : > { %p14_p7 = scmp.ge.s32.totalorder %s17_s19, 6   ;;  %s814_s13 = smov %s596_s14 }
 0x1ae   : > { %s815_s14 = smov %s709_s5  ;;  %s816_s15 = smov %s608_s17 }
 0x1af   : > { %s817_s16 = smov %s612_s18  ;;  %s818_s17 = smov %s821_s21 }
 0x1b0   : > { %s819_s18 = smov %s825_s22  ;;  %16 = sbr.rel (!%p14_p7) target bundleno = 5 (0x5), region = 84 }
 0x1b7   :  { %347 = vsyncpa [#allocation3], 1 }
 0x1b8   :  { %349 = vsyncpa [#allocation3 + $0x1], 1 }

</bundles_post_ra>
